<compile_context>
chip_gen: v7x
topology: tpu7x:2x2x1
jax: 0.10.0
libtpu: 0.0.40
codegen_flags: <defaults>
</compile_context>

<pallas_src>
import functools

import jax
import jax.numpy as jnp
from jax import lax
from jax.experimental import pallas as pl
from jax.experimental.pallas import tpu as pltpu

BN_EPS = 1e-5
VMEM_LIMIT_BYTES = 32 * 1024 * 1024     # explicit scoped-VMEM limit (all gens)
VMEM_TILE_BUDGET = 20 * 1024 * 1024     # target working set when picking TB


def _round_up(n, m):
    return ((n + m - 1) // m) * m


def _resident_spec(shape):
    """Constant-index BlockSpec; single-buffered when the jax version allows."""
    index_map = lambda t: (0, 0)
    try:
        return pl.BlockSpec(shape, index_map, pipeline_mode=pl.Buffered(1))
    except Exception:  # older jax without pipeline_mode -> default (2 buffers)
        return pl.BlockSpec(shape, index_map)


# --------------------------------------------------------------------------- #
# Kernels                                                                     #
# --------------------------------------------------------------------------- #
def _layer_kernel(*refs, batch, tile_b, in_bn, mask_rows):
    """One Linear layer: (optional BN+ReLU of cached input) -> matmul ->
    cache pre-BN output (bf16) -> accumulate batch stats -> fold scale/shift."""
    if in_bn:
        (a_ref, sc_in, sh_in, w_ref, g_ref, be_ref,
         h_ref, scale_ref, shift_ref) = refs
    else:
        a_ref, w_ref, g_ref, be_ref, h_ref, scale_ref, shift_ref = refs
        sc_in = sh_in = None

    t = pl.program_id(0)
    last = pl.num_programs(0) - 1

    a = a_ref[...]                                   # (TB, K) bf16
    if in_bn:
        # BN + ReLU of the previous layer's cached pre-BN activations (f32).
        a = jnp.maximum(a.astype(jnp.float32) * sc_in[...] + sh_in[...], 0.0)
        if mask_rows:
            # Zero padded batch rows so they cannot pollute this layer's stats.
            row = t * tile_b + lax.broadcasted_iota(jnp.int32, (tile_b, 1), 0)
            a = jnp.where(row < batch, a, 0.0)
        a = a.astype(jnp.bfloat16)

    # NOTE: linear bias dropped on purpose — train-mode BN cancels it exactly.
    h = jnp.dot(a, w_ref[...], preferred_element_type=jnp.float32)
    hb = h.astype(jnp.bfloat16)
    h_ref[...] = hb                                  # cache pre-BN h (bf16)
    hq = hb.astype(jnp.float32)                      # stats over cached values

    @pl.when(t == 0)
    def _():
        scale_ref[...] = jnp.zeros_like(scale_ref)
        shift_ref[...] = jnp.zeros_like(shift_ref)

    # Single-pass stats (sum, sum-of-squares) in exact f32.  Kept on the
    # VPU/XLU rather than a ones@h MXU matmul to avoid bf16 rounding in sums
    # (the E[h^2]-mu^2 form is already the cancellation-sensitive part).
    scale_ref[...] += jnp.sum(hq, axis=0, keepdims=True)
    shift_ref[...] += jnp.sum(hq * hq, axis=0, keepdims=True)

    @pl.when(t == last)
    def _():
        inv_b = 1.0 / batch                          # divide by TRUE batch size
        mu = scale_ref[...] * inv_b
        var = jnp.maximum(shift_ref[...] * inv_b - mu * mu, 0.0)
        scale = g_ref[...] * lax.rsqrt(var + BN_EPS)
        scale_ref[...] = scale                       # y = h*scale + shift
        shift_ref[...] = be_ref[...] - mu * scale


def _logsoftmax_kernel(h_ref, sc_ref, sh_ref, out_ref, *, label_num):
    """Final BN+ReLU of cached h3 followed by a masked log-softmax."""
    h = h_ref[...].astype(jnp.float32)
    a = jnp.maximum(h * sc_ref[...] + sh_ref[...], 0.0)
    col = lax.broadcasted_iota(jnp.int32, a.shape, 1)
    z = jnp.where(col < label_num, a, -1e30)         # mask padded label lanes
    z = z - jnp.max(z, axis=1, keepdims=True)
    lse = jnp.log(jnp.sum(jnp.exp(z), axis=1, keepdims=True))
    out_ref[...] = z - lse                           # lane-dense f32 store


# --------------------------------------------------------------------------- #
# pallas_call wrappers                                                        #
# --------------------------------------------------------------------------- #
def _layer_call(a, w, g, be, sc_in, sh_in, *, batch, tile_b):
    Bp, K = a.shape
    N = w.shape[1]
    n_tiles = Bp // tile_b
    in_bn = sc_in is not None

    in_specs = [pl.BlockSpec((tile_b, K), lambda t: (t, 0))]   # streamed tiles
    args = [a]
    if in_bn:
        in_specs += [_resident_spec((1, K)), _resident_spec((1, K))]
        args += [sc_in, sh_in]
    in_specs += [_resident_spec((K, N)),                        # weight
                 _resident_spec((1, N)),                        # gamma
                 _resident_spec((1, N))]                        # beta
    args += [w, g, be]

    kernel = functools.partial(
        _layer_kernel, batch=batch, tile_b=tile_b, in_bn=in_bn,
        mask_rows=(Bp != batch))

    return pl.pallas_call(
        kernel,
        out_shape=(jax.ShapeDtypeStruct((Bp, N), jnp.bfloat16),  # cached h
                   jax.ShapeDtypeStruct((1, N), jnp.float32),    # scale
                   jax.ShapeDtypeStruct((1, N), jnp.float32)),   # shift
        grid_spec=pltpu.PrefetchScalarGridSpec(
            num_scalar_prefetch=0,
            grid=(n_tiles,),
            in_specs=in_specs,
            out_specs=(pl.BlockSpec((tile_b, N), lambda t: (t, 0)),
                       pl.BlockSpec((1, N), lambda t: (0, 0)),
                       pl.BlockSpec((1, N), lambda t: (0, 0))),
        ),
        # Cross-tile stats accumulator -> tile axis must stay sequential.
        compiler_params=pltpu.CompilerParams(
            dimension_semantics=("arbitrary",),
            vmem_limit_bytes=VMEM_LIMIT_BYTES),
    )(*args)


def _final_call(h, sc, sh, *, tile_b, label_num):
    Bp, N = h.shape
    n_tiles = Bp // tile_b
    return pl.pallas_call(
        functools.partial(_logsoftmax_kernel, label_num=label_num),
        out_shape=jax.ShapeDtypeStruct((Bp, N), jnp.float32),
        grid_spec=pltpu.PrefetchScalarGridSpec(
            num_scalar_prefetch=0,
            grid=(n_tiles,),
            in_specs=[pl.BlockSpec((tile_b, N), lambda t: (t, 0)),
                      _resident_spec((1, N)),
                      _resident_spec((1, N))],
            out_specs=pl.BlockSpec((tile_b, N), lambda t: (t, 0)),
        ),
        # No cross-tile state -> usable by both v7x TensorCores.
        compiler_params=pltpu.CompilerParams(
            dimension_semantics=("parallel",),
            vmem_limit_bytes=VMEM_LIMIT_BYTES),
    )(h, sc, sh)


def _pick_tile_b(B, matmul_dims, n3, block_b=None,
                 budget_bytes=VMEM_TILE_BUDGET):
    """Largest batch tile (multiple of 16) whose per-call working set fits the
    VMEM budget: single-buffered weight + 2x bf16 in/out tiles + f32/bf16
    intermediates + small stats vectors."""
    tb = _round_up(B, 16)
    if block_b is not None:
        tb = min(tb, max(16, (int(block_b) // 16) * 16))
    for K, N in matmul_dims:
        fixed = K * N * 2 + 8 * N * 4 + (256 << 10)    # weight + vectors + slack
        per_row = (4 * K + 4 * N)                      # double-buffered bf16 tiles
        per_row += (6 * K + 10 * N)                    # f32/bf16 intermediates
        avail = max(budget_bytes - fixed, 16 * per_row)
        tb = min(tb, max(16, (avail // per_row // 16) * 16))
    per_row_f = 4 * n3 + 8 * n3 + 16 * n3              # final call (f32 out)
    tb = min(tb, max(16, (budget_bytes // per_row_f // 16) * 16))
    return max(16, tb)


@functools.partial(jax.jit, static_argnames=("block_b",))
def lr_forward(x, params, *, block_b=None):
    B, input_dim = x.shape
    hidden_dim = params["w1"].shape[1]
    half_dim = params["w2"].shape[1]
    label_num = params["w3"].shape[1]

    # Lane-dense (multiple-of-128) padded feature sizes.
    K1 = _round_up(input_dim, 128)
    N1 = _round_up(hidden_dim, 128)
    N2 = _round_up(half_dim, 128)
    N3 = _round_up(label_num, 128)

    TB = _pick_tile_b(B, [(K1, N1), (N1, N2), (N2, N3)], N3, block_b=block_b)
    Bp = _round_up(B, TB)

    def pad2(a, r, c):
        return jnp.pad(a, ((0, r - a.shape[0]), (0, c - a.shape[1])))

    # bf16 only for MXU operands; BN affine params stay f32.  (Single wrapper
    # pad/cast pass over x; b1/b2/b3 intentionally not passed — BN cancels them.)
    xp = pad2(x, Bp, K1).astype(jnp.bfloat16)
    w1 = pad2(params["w1"], K1, N1).astype(jnp.bfloat16)
    w2 = pad2(params["w2"], N1, N2).astype(jnp.bfloat16)
    w3 = pad2(params["w3"], N2, N3).astype(jnp.bfloat16)
    g1, be1 = pad2(params["g1"], 1, N1), pad2(params["be1"], 1, N1)
    g2, be2 = pad2(params["g2"], 1, N2), pad2(params["be2"], 1, N2)
    g3, be3 = pad2(params["g3"], 1, N3), pad2(params["be3"], 1, N3)

    h1, sc1, sh1 = _layer_call(xp, w1, g1, be1, None, None, batch=B, tile_b=TB)
    h2, sc2, sh2 = _layer_call(h1, w2, g2, be2, sc1, sh1, batch=B, tile_b=TB)
    h3, sc3, sh3 = _layer_call(h2, w3, g3, be3, sc2, sh2, batch=B, tile_b=TB)
    out = _final_call(h3, sc3, sh3, tile_b=TB, label_num=label_num)
    return out[:B, :label_num]


# --------------------------------------------------------------------------- #
# Params + references                                                         #
# --------------------------------------------------------------------------- #
def make_params(key, input_dim, hidden_dim, label_num):
    h2 = hidden_dim // 2
    keys = jax.random.split(key, 12)
    u = lambda k, shape, s: jax.random.uniform(k, shape, jnp.float32, -s, s)
    return {
        # Linear weights stored [in, out]; biases/BN params as [1, out].
        "w1": u(keys[0], (input_dim, hidden_dim), 0.3),
        "b1": u(keys[1], (1, hidden_dim), 0.1),
        "g1": 1.0 + u(keys[2], (1, hidden_dim), 0.2),
        "be1": u(keys[3], (1, hidden_dim), 0.1),
        "w2": u(keys[4], (hidden_dim, h2), 0.3),
        "b2": u(keys[5], (1, h2), 0.1),
        "g2": 1.0 + u(keys[6], (1, h2), 0.2),
        "be2": u(keys[7], (1, h2), 0.1),
        "w3": u(keys[8], (h2, label_num), 0.3),
        "b3": u(keys[9], (1, label_num), 0.1),
        "g3": 1.0 + u(keys[10], (1, label_num), 0.2),
        "be3": u(keys[11], (1, label_num), 0.1),
    }


def lr_reference_f32(x, p):
    """Faithful f32 forward of the PyTorch module (train-mode BN, biases kept)."""
    def bn_relu(h, g, b):
        mu = jnp.mean(h, axis=0, keepdims=True)
        var = jnp.mean((h - mu) ** 2, axis=0, keepdims=True)
        return jnp.maximum((h - mu) * lax.rsqrt(var + BN_EPS) * g + b, 0.0)

    h = bn_relu(x @ p["w1"] + p["b1"], p["g1"], p["be1"])
    h = bn_relu(h @ p["w2"] + p["b2"], p["g2"], p["be2"])
    h = bn_relu(h @ p["w3"] + p["b3"], p["g3"], p["be3"])
    return jax.nn.log_softmax(h, axis=1)


def lr_reference_mixed(x, p):
    """Reference mirroring the kernel's numerics (bf16 MXU operands, pre-BN h
    cached in bf16, f32 BN math, single-pass variance, folded scale/shift,
    biases dropped — they cancel under train-mode BN)."""
    def layer(a, w, g, b):
        h = jnp.dot(a.astype(jnp.bfloat16), w.astype(jnp.bfloat16),
                    preferred_element_type=jnp.float32)
        hb = h.astype(jnp.bfloat16).astype(jnp.float32)      # cached-in-bf16 h
        mu = jnp.mean(hb, axis=0, keepdims=True)
        var = jnp.maximum(jnp.mean(hb * hb, axis=0, keepdims=True) - mu * mu, 0.0)
        scale = g * lax.rsqrt(var + BN_EPS)
        return jnp.maximum(hb * scale + (b - mu * scale), 0.0)

    a = layer(x, p["w1"], p["g1"], p["be1"])
    a = layer(a, p["w2"], p["g2"], p["be2"])
    a = layer(a, p["w3"], p["g3"], p["be3"])
    return jax.nn.log_softmax(a, axis=1)


if __name__ == "__main__":
    # Small deterministic test: B=60 with block_b=16 -> 4 batch tiles, padded
    # batch rows (Bp=64) exercising the cross-tile stats accumulation + masking.
    B, input_dim, hidden_dim, label_num = 60, 32, 32, 4

    key = jax.random.PRNGKey(0)
    kx, kp = jax.random.split(key)
    x = jax.random.normal(kx, (B, input_dim), jnp.float32)
    params = make_params(kp, input_dim, hidden_dim, label_num)

    out = lr_forward(x, params, block_b=16)
    out = jax.block_until_ready(out)

    assert out.shape == (B, label_num)
    # Tight check vs a reference mirroring the kernel's numerics.
    ref_mixed = lr_reference_mixed(x, params)
    assert jnp.allclose(out, ref_mixed, atol=5e-3, rtol=5e-3), \
        "mismatch vs mixed-precision reference"
    # Loose semantic check vs the faithful f32 PyTorch-style forward
    # (difference is only bf16 matmul / caching rounding).
    ref_f32 = lr_reference_f32(x, params)
    assert jnp.allclose(out, ref_f32, atol=1.5e-1, rtol=0.0), \
        "mismatch vs f32 reference"

    print("KERNEL_OK")
</pallas_src>

<mosaic_0001>
module attributes {stable_mosaic.version = 11 : i64} {
  func.func @_layer_kernel(%arg0: i32, %arg1: memref<16x128xbf16, #tpu.memory_space<vmem>>, %arg2: memref<1x128xf32, #tpu.memory_space<vmem>>, %arg3: memref<1x128xf32, #tpu.memory_space<vmem>>, %arg4: memref<128x128xbf16, #tpu.memory_space<vmem>>, %arg5: memref<1x128xf32, #tpu.memory_space<vmem>>, %arg6: memref<1x128xf32, #tpu.memory_space<vmem>>, %arg7: memref<16x128xbf16, #tpu.memory_space<vmem>>, %arg8: memref<1x128xf32, #tpu.memory_space<vmem>>, %arg9: memref<1x128xf32, #tpu.memory_space<vmem>>) attributes {dimension_semantics = [#tpu.dimension_semantics<arbitrary>], iteration_bounds = array<i64: 4>, scalar_prefetch = 0 : i64, scratch_operands = 0 : i64, tpu.core_type = #tpu.core_type<tc>, window_params = [{transform_indices = @transform_0, window_bounds = array<i64: 16, 128>}, {pipeline_mode = #tpu.pipeline_mode<synchronous>, transform_indices = @transform_1, window_bounds = array<i64: 1, 128>}, {pipeline_mode = #tpu.pipeline_mode<synchronous>, transform_indices = @transform_2, window_bounds = array<i64: 1, 128>}, {pipeline_mode = #tpu.pipeline_mode<synchronous>, transform_indices = @transform_3, window_bounds = array<i64: 128, 128>}, {pipeline_mode = #tpu.pipeline_mode<synchronous>, transform_indices = @transform_4, window_bounds = array<i64: 1, 128>}, {pipeline_mode = #tpu.pipeline_mode<synchronous>, transform_indices = @transform_5, window_bounds = array<i64: 1, 128>}, {transform_indices = @transform_6, window_bounds = array<i64: 16, 128>}, {pipeline_mode = #tpu.pipeline_mode<synchronous>, transform_indices = @transform_7, window_bounds = array<i64: 1, 128>}, {pipeline_mode = #tpu.pipeline_mode<synchronous>, transform_indices = @transform_8, window_bounds = array<i64: 1, 128>}]} {
    %c0 = arith.constant 0 : index
    %c0_0 = arith.constant 0 : index
    %0 = vector.load %arg1[%c0, %c0_0] : memref<16x128xbf16, #tpu.memory_space<vmem>>, vector<16x128xbf16>
    %1 = arith.extf %0 : vector<16x128xbf16> to vector<16x128xf32>
    %c0_1 = arith.constant 0 : index
    %c0_2 = arith.constant 0 : index
    %2 = vector.load %arg2[%c0_1, %c0_2] : memref<1x128xf32, #tpu.memory_space<vmem>>, vector<1x128xf32>
    %3 = vector.broadcast %2 : vector<1x128xf32> to vector<16x128xf32>
    %4 = arith.mulf %1, %3 : vector<16x128xf32>
    %c0_3 = arith.constant 0 : index
    %c0_4 = arith.constant 0 : index
    %5 = vector.load %arg3[%c0_3, %c0_4] : memref<1x128xf32, #tpu.memory_space<vmem>>, vector<1x128xf32>
    %6 = vector.broadcast %5 : vector<1x128xf32> to vector<16x128xf32>
    %7 = arith.addf %4, %6 : vector<16x128xf32>
    %cst = arith.constant 0.000000e+00 : f32
    %8 = vector.broadcast %cst : f32 to vector<16x128xf32>
    %9 = arith.maximumf %7, %8 : vector<16x128xf32>
    %c16_i32 = arith.constant 16 : i32
    %10 = arith.muli %arg0, %c16_i32 : i32
    %11 = tpu.iota {dimensions = array<i32: 0>} : vector<16x1xi32>
    %12 = vector.broadcast %10 : i32 to vector<16x1xi32>
    %13 = arith.addi %12, %11 : vector<16x1xi32>
    %c60_i32 = arith.constant 60 : i32
    %14 = vector.broadcast %c60_i32 : i32 to vector<16x1xi32>
    %15 = arith.cmpi slt, %13, %14 : vector<16x1xi32>
    %cst_5 = arith.constant 0.000000e+00 : f32
    %16 = vector.shape_cast %15 : vector<16x1xi1> to vector<16x1xi1>
    %17 = vector.broadcast %16 : vector<16x1xi1> to vector<16x128xi1>
    %18 = vector.broadcast %cst_5 : f32 to vector<16x128xf32>
    %19 = arith.select %17, %9, %18 : vector<16x128xi1>, vector<16x128xf32>
    %20 = arith.truncf %19 : vector<16x128xf32> to vector<16x128xbf16>
    %c0_6 = arith.constant 0 : index
    %c0_7 = arith.constant 0 : index
    %21 = vector.load %arg4[%c0_6, %c0_7] : memref<128x128xbf16, #tpu.memory_space<vmem>>, vector<128x128xbf16>
    %cst_8 = arith.constant dense<0.000000e+00> : vector<16x128xf32>
    %22 = tpu.matmul %20, %21, %cst_8 {dimension_numbers = #tpu.dot_dimension_numbers<[1], [0], [0], [1], [0, 0, 1, 1], [], []>} : vector<16x128xbf16>, vector<128x128xbf16>, vector<16x128xf32> -> vector<16x128xf32>
    %23 = arith.truncf %22 : vector<16x128xf32> to vector<16x128xbf16>
    %c0_9 = arith.constant 0 : index
    %c0_10 = arith.constant 0 : index
    %24 = vector.load %arg7[%c0_9, %c0_10] : memref<16x128xbf16, #tpu.memory_space<vmem>>, vector<16x128xbf16>
    tpu.vector_store %arg7[%c0_9, %c0_10], %23 {strides = array<i32>} : memref<16x128xbf16, #tpu.memory_space<vmem>>, vector<16x128xbf16>,
    %25 = arith.extf %23 : vector<16x128xbf16> to vector<16x128xf32>
    %c0_i32 = arith.constant 0 : i32
    %26 = arith.cmpi eq, %arg0, %c0_i32 : i32
    %27 = arith.extui %26 : i1 to i32
    %c0_i32_11 = arith.constant 0 : i32
    %28 = arith.cmpi ne, %27, %c0_i32_11 : i32
    scf.if %28 {
      %cst_23 = arith.constant 0.000000e+00 : f32
      %43 = vector.broadcast %cst_23 : f32 to vector<1x128xf32>
      %c0_24 = arith.constant 0 : index
      %c0_25 = arith.constant 0 : index
      %44 = vector.load %arg8[%c0_24, %c0_25] : memref<1x128xf32, #tpu.memory_space<vmem>>, vector<1x128xf32>
      tpu.vector_store %arg8[%c0_24, %c0_25], %43 {strides = array<i32>} : memref<1x128xf32, #tpu.memory_space<vmem>>, vector<1x128xf32>,
      %cst_26 = arith.constant 0.000000e+00 : f32
      %45 = vector.broadcast %cst_26 : f32 to vector<1x128xf32>
      %c0_27 = arith.constant 0 : index
      %c0_28 = arith.constant 0 : index
      %46 = vector.load %arg9[%c0_27, %c0_28] : memref<1x128xf32, #tpu.memory_space<vmem>>, vector<1x128xf32>
      tpu.vector_store %arg9[%c0_27, %c0_28], %45 {strides = array<i32>} : memref<1x128xf32, #tpu.memory_space<vmem>>, vector<1x128xf32>,
    } else {
    }
    %c0_12 = arith.constant 0 : index
    %c0_13 = arith.constant 0 : index
    %29 = vector.load %arg8[%c0_12, %c0_13] : memref<1x128xf32, #tpu.memory_space<vmem>>, vector<1x128xf32>
    %cst_14 = arith.constant dense<0.000000e+00> : vector<128xf32>
    %30 = vector.multi_reduction <add>, %25, %cst_14 [0] : vector<16x128xf32> to vector<128xf32>
    %31 = vector.shape_cast %30 : vector<128xf32> to vector<1x128xf32>
    %32 = arith.addf %29, %31 : vector<1x128xf32>
    %c0_15 = arith.constant 0 : index
    %c0_16 = arith.constant 0 : index
    %33 = vector.load %arg8[%c0_15, %c0_16] : memref<1x128xf32, #tpu.memory_space<vmem>>, vector<1x128xf32>
    tpu.vector_store %arg8[%c0_15, %c0_16], %32 {strides = array<i32>} : memref<1x128xf32, #tpu.memory_space<vmem>>, vector<1x128xf32>,
    %c0_17 = arith.constant 0 : index
    %c0_18 = arith.constant 0 : index
    %34 = vector.load %arg9[%c0_17, %c0_18] : memref<1x128xf32, #tpu.memory_space<vmem>>, vector<1x128xf32>
    %35 = arith.mulf %25, %25 : vector<16x128xf32>
    %cst_19 = arith.constant dense<0.000000e+00> : vector<128xf32>
    %36 = vector.multi_reduction <add>, %35, %cst_19 [0] : vector<16x128xf32> to vector<128xf32>
    %37 = vector.shape_cast %36 : vector<128xf32> to vector<1x128xf32>
    %38 = arith.addf %34, %37 : vector<1x128xf32>
    %c0_20 = arith.constant 0 : index
    %c0_21 = arith.constant 0 : index
    %39 = vector.load %arg9[%c0_20, %c0_21] : memref<1x128xf32, #tpu.memory_space<vmem>>, vector<1x128xf32>
    tpu.vector_store %arg9[%c0_20, %c0_21], %38 {strides = array<i32>} : memref<1x128xf32, #tpu.memory_space<vmem>>, vector<1x128xf32>,
    %c3_i32 = arith.constant 3 : i32
    %40 = arith.cmpi eq, %arg0, %c3_i32 : i32
    %41 = arith.extui %40 : i1 to i32
    %c0_i32_22 = arith.constant 0 : i32
    %42 = arith.cmpi ne, %41, %c0_i32_22 : i32
    scf.if %42 {
      %c0_23 = arith.constant 0 : index
      %c0_24 = arith.constant 0 : index
      %43 = vector.load %arg8[%c0_23, %c0_24] : memref<1x128xf32, #tpu.memory_space<vmem>>, vector<1x128xf32>
      %cst_25 = arith.constant 0.0166666675 : f32
      %44 = vector.broadcast %cst_25 : f32 to vector<1x128xf32>
      %45 = arith.mulf %43, %44 : vector<1x128xf32>
      %c0_26 = arith.constant 0 : index
      %c0_27 = arith.constant 0 : index
      %46 = vector.load %arg9[%c0_26, %c0_27] : memref<1x128xf32, #tpu.memory_space<vmem>>, vector<1x128xf32>
      %cst_28 = arith.constant 0.0166666675 : f32
      %47 = vector.broadcast %cst_28 : f32 to vector<1x128xf32>
      %48 = arith.mulf %46, %47 : vector<1x128xf32>
      %49 = arith.mulf %45, %45 : vector<1x128xf32>
      %50 = arith.subf %48, %49 : vector<1x128xf32>
      %cst_29 = arith.constant 0.000000e+00 : f32
      %51 = vector.broadcast %cst_29 : f32 to vector<1x128xf32>
      %52 = arith.maximumf %50, %51 : vector<1x128xf32>
      %c0_30 = arith.constant 0 : index
      %c0_31 = arith.constant 0 : index
      %53 = vector.load %arg5[%c0_30, %c0_31] : memref<1x128xf32, #tpu.memory_space<vmem>>, vector<1x128xf32>
      %cst_32 = arith.constant 9.99999974E-6 : f32
      %54 = vector.broadcast %cst_32 : f32 to vector<1x128xf32>
      %55 = arith.addf %52, %54 : vector<1x128xf32>
      %56 = math.rsqrt %55 : vector<1x128xf32>
      %57 = arith.mulf %53, %56 : vector<1x128xf32>
      %c0_33 = arith.constant 0 : index
      %c0_34 = arith.constant 0 : index
      %58 = vector.load %arg8[%c0_33, %c0_34] : memref<1x128xf32, #tpu.memory_space<vmem>>, vector<1x128xf32>
      tpu.vector_store %arg8[%c0_33, %c0_34], %57 {strides = array<i32>} : memref<1x128xf32, #tpu.memory_space<vmem>>, vector<1x128xf32>,
      %c0_35 = arith.constant 0 : index
      %c0_36 = arith.constant 0 : index
      %59 = vector.load %arg6[%c0_35, %c0_36] : memref<1x128xf32, #tpu.memory_space<vmem>>, vector<1x128xf32>
      %60 = arith.mulf %45, %57 : vector<1x128xf32>
      %61 = arith.subf %59, %60 : vector<1x128xf32>
      %c0_37 = arith.constant 0 : index
      %c0_38 = arith.constant 0 : index
      %62 = vector.load %arg9[%c0_37, %c0_38] : memref<1x128xf32, #tpu.memory_space<vmem>>, vector<1x128xf32>
      tpu.vector_store %arg9[%c0_37, %c0_38], %61 {strides = array<i32>} : memref<1x128xf32, #tpu.memory_space<vmem>>, vector<1x128xf32>,
    } else {
    }
    return
  }
  func.func @transform_0(%arg0: i32) -> (i32, i32) {
    %c0_i32 = arith.constant 0 : i32
    %c0_i32_0 = arith.constant 0 : i32
    return %arg0, %c0_i32 : i32, i32
  }
  func.func @transform_1(%arg0: i32) -> (i32, i32) {
    %c0_i32 = arith.constant 0 : i32
    %c0_i32_0 = arith.constant 0 : i32
    %c0_i32_1 = arith.constant 0 : i32
    return %c0_i32, %c0_i32_0 : i32, i32
  }
  func.func @transform_2(%arg0: i32) -> (i32, i32) {
    %c0_i32 = arith.constant 0 : i32
    %c0_i32_0 = arith.constant 0 : i32
    %c0_i32_1 = arith.constant 0 : i32
    return %c0_i32, %c0_i32_0 : i32, i32
  }
  func.func @transform_3(%arg0: i32) -> (i32, i32) {
    %c0_i32 = arith.constant 0 : i32
    %c0_i32_0 = arith.constant 0 : i32
    %c0_i32_1 = arith.constant 0 : i32
    return %c0_i32, %c0_i32_0 : i32, i32
  }
  func.func @transform_4(%arg0: i32) -> (i32, i32) {
    %c0_i32 = arith.constant 0 : i32
    %c0_i32_0 = arith.constant 0 : i32
    %c0_i32_1 = arith.constant 0 : i32
    return %c0_i32, %c0_i32_0 : i32, i32
  }
  func.func @transform_5(%arg0: i32) -> (i32, i32) {
    %c0_i32 = arith.constant 0 : i32
    %c0_i32_0 = arith.constant 0 : i32
    %c0_i32_1 = arith.constant 0 : i32
    return %c0_i32, %c0_i32_0 : i32, i32
  }
  func.func @transform_6(%arg0: i32) -> (i32, i32) {
    %c0_i32 = arith.constant 0 : i32
    %c0_i32_0 = arith.constant 0 : i32
    return %arg0, %c0_i32 : i32, i32
  }
  func.func @transform_7(%arg0: i32) -> (i32, i32) {
    %c0_i32 = arith.constant 0 : i32
    %c0_i32_0 = arith.constant 0 : i32
    %c0_i32_1 = arith.constant 0 : i32
    return %c0_i32, %c0_i32_0 : i32, i32
  }
  func.func @transform_8(%arg0: i32) -> (i32, i32) {
    %c0_i32 = arith.constant 0 : i32
    %c0_i32_0 = arith.constant 0 : i32
    %c0_i32_1 = arith.constant 0 : i32
    return %c0_i32, %c0_i32_0 : i32, i32
  }
}

module attributes {stable_mosaic.version = 11 : i64} {
  func.func @_logsoftmax_kernel(%arg0: i32, %arg1: memref<16x128xbf16, #tpu.memory_space<vmem>>, %arg2: memref<1x128xf32, #tpu.memory_space<vmem>>, %arg3: memref<1x128xf32, #tpu.memory_space<vmem>>, %arg4: memref<16x128xf32, #tpu.memory_space<vmem>>) attributes {dimension_semantics = [#tpu.dimension_semantics<parallel>], iteration_bounds = array<i64: 4>, scalar_prefetch = 0 : i64, scratch_operands = 0 : i64, tpu.core_type = #tpu.core_type<tc>, window_params = [{transform_indices = @transform_0, window_bounds = array<i64: 16, 128>}, {pipeline_mode = #tpu.pipeline_mode<synchronous>, transform_indices = @transform_1, window_bounds = array<i64: 1, 128>}, {pipeline_mode = #tpu.pipeline_mode<synchronous>, transform_indices = @transform_2, window_bounds = array<i64: 1, 128>}, {transform_indices = @transform_3, window_bounds = array<i64: 16, 128>}]} {
    %c0 = arith.constant 0 : index
    %c0_0 = arith.constant 0 : index
    %0 = vector.load %arg1[%c0, %c0_0] : memref<16x128xbf16, #tpu.memory_space<vmem>>, vector<16x128xbf16>
    %1 = arith.extf %0 : vector<16x128xbf16> to vector<16x128xf32>
    %c0_1 = arith.constant 0 : index
    %c0_2 = arith.constant 0 : index
    %2 = vector.load %arg2[%c0_1, %c0_2] : memref<1x128xf32, #tpu.memory_space<vmem>>, vector<1x128xf32>
    %3 = vector.broadcast %2 : vector<1x128xf32> to vector<16x128xf32>
    %4 = arith.mulf %1, %3 : vector<16x128xf32>
    %c0_3 = arith.constant 0 : index
    %c0_4 = arith.constant 0 : index
    %5 = vector.load %arg3[%c0_3, %c0_4] : memref<1x128xf32, #tpu.memory_space<vmem>>, vector<1x128xf32>
    %6 = vector.broadcast %5 : vector<1x128xf32> to vector<16x128xf32>
    %7 = arith.addf %4, %6 : vector<16x128xf32>
    %cst = arith.constant 0.000000e+00 : f32
    %8 = vector.broadcast %cst : f32 to vector<16x128xf32>
    %9 = arith.maximumf %7, %8 : vector<16x128xf32>
    %10 = tpu.iota {dimensions = array<i32: 1>} : vector<16x128xi32>
    %c4_i32 = arith.constant 4 : i32
    %11 = vector.broadcast %c4_i32 : i32 to vector<16x128xi32>
    %12 = arith.cmpi slt, %10, %11 : vector<16x128xi32>
    %cst_5 = arith.constant -1.000000e+30 : f32
    %13 = vector.broadcast %cst_5 : f32 to vector<16x128xf32>
    %14 = arith.select %12, %9, %13 : vector<16x128xi1>, vector<16x128xf32>
    %cst_6 = arith.constant dense<0xFF800000> : vector<16xf32>
    %15 = vector.multi_reduction <maximumf>, %14, %cst_6 [1] : vector<16x128xf32> to vector<16xf32>
    %16 = vector.shape_cast %15 : vector<16xf32> to vector<16x1xf32>
    %17 = vector.broadcast %16 : vector<16x1xf32> to vector<16x128xf32>
    %18 = arith.subf %14, %17 : vector<16x128xf32>
    %19 = math.exp %18 : vector<16x128xf32>
    %cst_7 = arith.constant dense<0.000000e+00> : vector<16xf32>
    %20 = vector.multi_reduction <add>, %19, %cst_7 [1] : vector<16x128xf32> to vector<16xf32>
    %21 = vector.shape_cast %20 : vector<16xf32> to vector<16x1xf32>
    %22 = math.log %21 : vector<16x1xf32>
    %23 = vector.broadcast %22 : vector<16x1xf32> to vector<16x128xf32>
    %24 = arith.subf %18, %23 : vector<16x128xf32>
    %c0_8 = arith.constant 0 : index
    %c0_9 = arith.constant 0 : index
    %25 = vector.load %arg4[%c0_8, %c0_9] : memref<16x128xf32, #tpu.memory_space<vmem>>, vector<16x128xf32>
    tpu.vector_store %arg4[%c0_8, %c0_9], %24 {strides = array<i32>} : memref<16x128xf32, #tpu.memory_space<vmem>>, vector<16x128xf32>,
    return
  }
  func.func @transform_0(%arg0: i32) -> (i32, i32) {
    %c0_i32 = arith.constant 0 : i32
    %c0_i32_0 = arith.constant 0 : i32
    return %arg0, %c0_i32 : i32, i32
  }
  func.func @transform_1(%arg0: i32) -> (i32, i32) {
    %c0_i32 = arith.constant 0 : i32
    %c0_i32_0 = arith.constant 0 : i32
    %c0_i32_1 = arith.constant 0 : i32
    return %c0_i32, %c0_i32_0 : i32, i32
  }
  func.func @transform_2(%arg0: i32) -> (i32, i32) {
    %c0_i32 = arith.constant 0 : i32
    %c0_i32_0 = arith.constant 0 : i32
    %c0_i32_1 = arith.constant 0 : i32
    return %c0_i32, %c0_i32_0 : i32, i32
  }
  func.func @transform_3(%arg0: i32) -> (i32, i32) {
    %c0_i32 = arith.constant 0 : i32
    %c0_i32_0 = arith.constant 0 : i32
    return %arg0, %c0_i32 : i32, i32
  }
}

module attributes {stable_mosaic.version = 11 : i64} {
  func.func @_layer_kernel(%arg0: i32, %arg1: memref<16x128xbf16, #tpu.memory_space<vmem>>, %arg2: memref<128x128xbf16, #tpu.memory_space<vmem>>, %arg3: memref<1x128xf32, #tpu.memory_space<vmem>>, %arg4: memref<1x128xf32, #tpu.memory_space<vmem>>, %arg5: memref<16x128xbf16, #tpu.memory_space<vmem>>, %arg6: memref<1x128xf32, #tpu.memory_space<vmem>>, %arg7: memref<1x128xf32, #tpu.memory_space<vmem>>) attributes {dimension_semantics = [#tpu.dimension_semantics<arbitrary>], iteration_bounds = array<i64: 4>, scalar_prefetch = 0 : i64, scratch_operands = 0 : i64, tpu.core_type = #tpu.core_type<tc>, window_params = [{transform_indices = @transform_0, window_bounds = array<i64: 16, 128>}, {pipeline_mode = #tpu.pipeline_mode<synchronous>, transform_indices = @transform_1, window_bounds = array<i64: 128, 128>}, {pipeline_mode = #tpu.pipeline_mode<synchronous>, transform_indices = @transform_2, window_bounds = array<i64: 1, 128>}, {pipeline_mode = #tpu.pipeline_mode<synchronous>, transform_indices = @transform_3, window_bounds = array<i64: 1, 128>}, {transform_indices = @transform_4, window_bounds = array<i64: 16, 128>}, {pipeline_mode = #tpu.pipeline_mode<synchronous>, transform_indices = @transform_5, window_bounds = array<i64: 1, 128>}, {pipeline_mode = #tpu.pipeline_mode<synchronous>, transform_indices = @transform_6, window_bounds = array<i64: 1, 128>}]} {
    %c0 = arith.constant 0 : index
    %c0_0 = arith.constant 0 : index
    %0 = vector.load %arg1[%c0, %c0_0] : memref<16x128xbf16, #tpu.memory_space<vmem>>, vector<16x128xbf16>
    %c0_1 = arith.constant 0 : index
    %c0_2 = arith.constant 0 : index
    %1 = vector.load %arg2[%c0_1, %c0_2] : memref<128x128xbf16, #tpu.memory_space<vmem>>, vector<128x128xbf16>
    %cst = arith.constant dense<0.000000e+00> : vector<16x128xf32>
    %2 = tpu.matmul %0, %1, %cst {dimension_numbers = #tpu.dot_dimension_numbers<[1], [0], [0], [1], [0, 0, 1, 1], [], []>} : vector<16x128xbf16>, vector<128x128xbf16>, vector<16x128xf32> -> vector<16x128xf32>
    %3 = arith.truncf %2 : vector<16x128xf32> to vector<16x128xbf16>
    %c0_3 = arith.constant 0 : index
    %c0_4 = arith.constant 0 : index
    %4 = vector.load %arg5[%c0_3, %c0_4] : memref<16x128xbf16, #tpu.memory_space<vmem>>, vector<16x128xbf16>
    tpu.vector_store %arg5[%c0_3, %c0_4], %3 {strides = array<i32>} : memref<16x128xbf16, #tpu.memory_space<vmem>>, vector<16x128xbf16>,
    %5 = arith.extf %3 : vector<16x128xbf16> to vector<16x128xf32>
    %c0_i32 = arith.constant 0 : i32
    %6 = arith.cmpi eq, %arg0, %c0_i32 : i32
    %7 = arith.extui %6 : i1 to i32
    %c0_i32_5 = arith.constant 0 : i32
    %8 = arith.cmpi ne, %7, %c0_i32_5 : i32
    scf.if %8 {
      %cst_17 = arith.constant 0.000000e+00 : f32
      %23 = vector.broadcast %cst_17 : f32 to vector<1x128xf32>
      %c0_18 = arith.constant 0 : index
      %c0_19 = arith.constant 0 : index
      %24 = vector.load %arg6[%c0_18, %c0_19] : memref<1x128xf32, #tpu.memory_space<vmem>>, vector<1x128xf32>
      tpu.vector_store %arg6[%c0_18, %c0_19], %23 {strides = array<i32>} : memref<1x128xf32, #tpu.memory_space<vmem>>, vector<1x128xf32>,
      %cst_20 = arith.constant 0.000000e+00 : f32
      %25 = vector.broadcast %cst_20 : f32 to vector<1x128xf32>
      %c0_21 = arith.constant 0 : index
      %c0_22 = arith.constant 0 : index
      %26 = vector.load %arg7[%c0_21, %c0_22] : memref<1x128xf32, #tpu.memory_space<vmem>>, vector<1x128xf32>
      tpu.vector_store %arg7[%c0_21, %c0_22], %25 {strides = array<i32>} : memref<1x128xf32, #tpu.memory_space<vmem>>, vector<1x128xf32>,
    } else {
    }
    %c0_6 = arith.constant 0 : index
    %c0_7 = arith.constant 0 : index
    %9 = vector.load %arg6[%c0_6, %c0_7] : memref<1x128xf32, #tpu.memory_space<vmem>>, vector<1x128xf32>
    %cst_8 = arith.constant dense<0.000000e+00> : vector<128xf32>
    %10 = vector.multi_reduction <add>, %5, %cst_8 [0] : vector<16x128xf32> to vector<128xf32>
    %11 = vector.shape_cast %10 : vector<128xf32> to vector<1x128xf32>
    %12 = arith.addf %9, %11 : vector<1x128xf32>
    %c0_9 = arith.constant 0 : index
    %c0_10 = arith.constant 0 : index
    %13 = vector.load %arg6[%c0_9, %c0_10] : memref<1x128xf32, #tpu.memory_space<vmem>>, vector<1x128xf32>
    tpu.vector_store %arg6[%c0_9, %c0_10], %12 {strides = array<i32>} : memref<1x128xf32, #tpu.memory_space<vmem>>, vector<1x128xf32>,
    %c0_11 = arith.constant 0 : index
    %c0_12 = arith.constant 0 : index
    %14 = vector.load %arg7[%c0_11, %c0_12] : memref<1x128xf32, #tpu.memory_space<vmem>>, vector<1x128xf32>
    %15 = arith.mulf %5, %5 : vector<16x128xf32>
    %cst_13 = arith.constant dense<0.000000e+00> : vector<128xf32>
    %16 = vector.multi_reduction <add>, %15, %cst_13 [0] : vector<16x128xf32> to vector<128xf32>
    %17 = vector.shape_cast %16 : vector<128xf32> to vector<1x128xf32>
    %18 = arith.addf %14, %17 : vector<1x128xf32>
    %c0_14 = arith.constant 0 : index
    %c0_15 = arith.constant 0 : index
    %19 = vector.load %arg7[%c0_14, %c0_15] : memref<1x128xf32, #tpu.memory_space<vmem>>, vector<1x128xf32>
    tpu.vector_store %arg7[%c0_14, %c0_15], %18 {strides = array<i32>} : memref<1x128xf32, #tpu.memory_space<vmem>>, vector<1x128xf32>,
    %c3_i32 = arith.constant 3 : i32
    %20 = arith.cmpi eq, %arg0, %c3_i32 : i32
    %21 = arith.extui %20 : i1 to i32
    %c0_i32_16 = arith.constant 0 : i32
    %22 = arith.cmpi ne, %21, %c0_i32_16 : i32
    scf.if %22 {
      %c0_17 = arith.constant 0 : index
      %c0_18 = arith.constant 0 : index
      %23 = vector.load %arg6[%c0_17, %c0_18] : memref<1x128xf32, #tpu.memory_space<vmem>>, vector<1x128xf32>
      %cst_19 = arith.constant 0.0166666675 : f32
      %24 = vector.broadcast %cst_19 : f32 to vector<1x128xf32>
      %25 = arith.mulf %23, %24 : vector<1x128xf32>
      %c0_20 = arith.constant 0 : index
      %c0_21 = arith.constant 0 : index
      %26 = vector.load %arg7[%c0_20, %c0_21] : memref<1x128xf32, #tpu.memory_space<vmem>>, vector<1x128xf32>
      %cst_22 = arith.constant 0.0166666675 : f32
      %27 = vector.broadcast %cst_22 : f32 to vector<1x128xf32>
      %28 = arith.mulf %26, %27 : vector<1x128xf32>
      %29 = arith.mulf %25, %25 : vector<1x128xf32>
      %30 = arith.subf %28, %29 : vector<1x128xf32>
      %cst_23 = arith.constant 0.000000e+00 : f32
      %31 = vector.broadcast %cst_23 : f32 to vector<1x128xf32>
      %32 = arith.maximumf %30, %31 : vector<1x128xf32>
      %c0_24 = arith.constant 0 : index
      %c0_25 = arith.constant 0 : index
      %33 = vector.load %arg3[%c0_24, %c0_25] : memref<1x128xf32, #tpu.memory_space<vmem>>, vector<1x128xf32>
      %cst_26 = arith.constant 9.99999974E-6 : f32
      %34 = vector.broadcast %cst_26 : f32 to vector<1x128xf32>
      %35 = arith.addf %32, %34 : vector<1x128xf32>
      %36 = math.rsqrt %35 : vector<1x128xf32>
      %37 = arith.mulf %33, %36 : vector<1x128xf32>
      %c0_27 = arith.constant 0 : index
      %c0_28 = arith.constant 0 : index
      %38 = vector.load %arg6[%c0_27, %c0_28] : memref<1x128xf32, #tpu.memory_space<vmem>>, vector<1x128xf32>
      tpu.vector_store %arg6[%c0_27, %c0_28], %37 {strides = array<i32>} : memref<1x128xf32, #tpu.memory_space<vmem>>, vector<1x128xf32>,
      %c0_29 = arith.constant 0 : index
      %c0_30 = arith.constant 0 : index
      %39 = vector.load %arg4[%c0_29, %c0_30] : memref<1x128xf32, #tpu.memory_space<vmem>>, vector<1x128xf32>
      %40 = arith.mulf %25, %37 : vector<1x128xf32>
      %41 = arith.subf %39, %40 : vector<1x128xf32>
      %c0_31 = arith.constant 0 : index
      %c0_32 = arith.constant 0 : index
      %42 = vector.load %arg7[%c0_31, %c0_32] : memref<1x128xf32, #tpu.memory_space<vmem>>, vector<1x128xf32>
      tpu.vector_store %arg7[%c0_31, %c0_32], %41 {strides = array<i32>} : memref<1x128xf32, #tpu.memory_space<vmem>>, vector<1x128xf32>,
    } else {
    }
    return
  }
  func.func @transform_0(%arg0: i32) -> (i32, i32) {
    %c0_i32 = arith.constant 0 : i32
    %c0_i32_0 = arith.constant 0 : i32
    return %arg0, %c0_i32 : i32, i32
  }
  func.func @transform_1(%arg0: i32) -> (i32, i32) {
    %c0_i32 = arith.constant 0 : i32
    %c0_i32_0 = arith.constant 0 : i32
    %c0_i32_1 = arith.constant 0 : i32
    return %c0_i32, %c0_i32_0 : i32, i32
  }
  func.func @transform_2(%arg0: i32) -> (i32, i32) {
    %c0_i32 = arith.constant 0 : i32
    %c0_i32_0 = arith.constant 0 : i32
    %c0_i32_1 = arith.constant 0 : i32
    return %c0_i32, %c0_i32_0 : i32, i32
  }
  func.func @transform_3(%arg0: i32) -> (i32, i32) {
    %c0_i32 = arith.constant 0 : i32
    %c0_i32_0 = arith.constant 0 : i32
    %c0_i32_1 = arith.constant 0 : i32
    return %c0_i32, %c0_i32_0 : i32, i32
  }
  func.func @transform_4(%arg0: i32) -> (i32, i32) {
    %c0_i32 = arith.constant 0 : i32
    %c0_i32_0 = arith.constant 0 : i32
    return %arg0, %c0_i32 : i32, i32
  }
  func.func @transform_5(%arg0: i32) -> (i32, i32) {
    %c0_i32 = arith.constant 0 : i32
    %c0_i32_0 = arith.constant 0 : i32
    %c0_i32_1 = arith.constant 0 : i32
    return %c0_i32, %c0_i32_0 : i32, i32
  }
  func.func @transform_6(%arg0: i32) -> (i32, i32) {
    %c0_i32 = arith.constant 0 : i32
    %c0_i32_0 = arith.constant 0 : i32
    %c0_i32_1 = arith.constant 0 : i32
    return %c0_i32, %c0_i32_0 : i32, i32
  }
}

</mosaic_0001>

<bundles_post_ra>
// kernel: lr_forward.7
= control target key start
LH: loop header
LB: loop body
LE: loop exit
PB: predicated region body
PF: predicated region fallthrough
CT: control target
= control target key end

     0   :  { %s342_s12 = smov 0   ;;  %s369_s0 = inlined_call_operand.vmem [shape: bf16[64,128], index: 0, kind: input, shape index: {}]   ;;  %s370_s1 = inlined_call_operand.vmem [shape: f32[1,128], index: 1, kind: input, shape index: {}]   ;;  %s371_s2 = inlined_call_operand.vmem [shape: f32[1,128], index: 2, kind: input, shape index: {}]   ;;  %s372_s3 = inlined_call_operand.vmem [shape: f32[64,128], index: 3, kind: output, shape index: {}]  }
   0x1 LB: > { %s281_s13 = sadd.s32 4294967295, %s320_s12   ;;  %p285_p0 = scmp.ge.s32.totalorder %s320_s12, 1  ;;  %s320_s12 = sphi %s342_s12, %s13_s12  }
   0x2   : > { %p138_p1 = scmp.lt.s32.totalorder %s320_s12, 5 }
   0x4   : > { %p139_p2 = pnand %p285_p0, %p138_p1 }
   0x5   : > { %s286_s14 = sshll.u32 (!%p139_p2), %s281_s13, 1  ;;  %v198_v0 = vlaneseq (!%p139_p2)  ;;  %v290_v2 = vld [vmem:[%s370_s1] ss:$0 sm:$0xff] (!%p139_p2) }
   0x6   : > { %142 = sbr.rel (%p139_p2) target bundleno = 345 (0x159), region = 32  ;;  %p163_p3 = scmp.lt.s32.totalorder (!%p139_p2), %s286_s14, 7  ;;  %v291_v5 = vld [vmem:[%s371_s2] ss:$0 sm:$0xff] (!%p139_p2) }
   0x7   : > { %v199_v6 = vand.u32 (!%p139_p2), 127, %v198_v0 }
   0x9   : > { %vm200_vm0 = vcmp.lt.s32.totalorder (!%p139_p2), %v199_v6, 4 }
   0xd   : > { %s374_s14 = smov (!%p163_p3, %s286_s14), 7 }
   0xe   : > { %s287_s15 = sshll.u32 %s374_s14, 2  ;;  %s289_s23 = sshll.u32 %s374_s14, 3 }
   0xf   : > { %s166_s18 = scalar_lea.vmem %s369_s0, %s287_s15  ;;  %s172_s26 = scalar_lea.vmem %s372_s3, %s289_s23 }
  0x10   : > { %v295_v1 = vld [vmem:[%s166_s18] sm:$0xff]  }
  0x11   : > { %v296_v3 = vunpack.c.l.bf16 %v295_v1  ;;  %v297_v4 = vunpack.c.h.bf16 %v295_v1 }
  0x13   : > { %v185_v7 = vmul.f32 %v296_v3, %v290_v2  ;;  %v186_v8 = vmul.f32 %v297_v4, %v290_v2 }
  0x15   : > { %v194_v9 = vadd.f32 %v291_v5, %v185_v7  ;;  %v195_v10 = vadd.f32 %v291_v5, %v186_v8 }
  0x17   : > { %v196_v11 = vmax.f32 %v194_v9, 0.0  ;;  %v197_v12 = vmax.f32 %v195_v10, 0.0 }
  0x19   : > { %v201_v13 = vsel %vm200_vm0, %v196_v11, -1e+30  ;;  %v202_v14 = vsel %vm200_vm0, %v197_v12, -1e+30 }
  0x1a   : > { %203 = vmax.xlane.f32.xlu0 %v201_v13 }
  0x1e   : > { %205 = vmax.xlane.f32.xlu0 %v202_v14 }
  0xa7   : > { %v204_v15 = vpop.xlane.xlu0 %203 }
  0xa8   : > { %v207_v16 = vsub.f32 %v201_v13, %v204_v15 }
  0xaa   : > { %v209_v17 = vmul.f32 1.442695, %v207_v16 }
  0xab   : > { %v206_v18 = vpop.xlane.xlu0 %205 }
  0xac   : > { %v208_v19 = vsub.f32 %v202_v14, %v206_v18  ;;  %306 = vpow2.f32 %v209_v17 }
  0xae   : > { %v211_v20 = vmul.f32 1.442695, %v208_v19 }
  0xb0   : > { %308 = vpow2.f32 %v211_v20 }
  0xb6   : > { %v307_v21 = vpop.eup %306 }
  0xb7   : > { %213 = vadd.xlane.f32.xlu1 %v307_v21 }
  0xba   : > { %v309_v22 = vpop.eup %308 }
  0xbb   : > { %215 = vadd.xlane.f32.xlu1 %v309_v22 }
 0x144   : > { %v214_v23 = vpop.xlane.xlu1 %213 }
 0x145   : > { %310 = vlog2.f32 %v214_v23 }
 0x148   : > { %v216_v24 = vpop.xlane.xlu1 %215 }
 0x149   : > { %312 = vlog2.f32 %v216_v24 }
 0x14f   : > { %v311_v25 = vpop.eup %310 }
 0x150   : > { %v218_v26 = vmul.f32 0.6931472, %v311_v25 }
 0x152   : > { %v221_v27 = vsub.f32 %v207_v16, %v218_v26 }
 0x153   : > { %v313_v28 = vpop.eup %312 }
 0x154   : > { %223 = vst [vmem:[%s172_s26] sm:$0xff] %v221_v27  ;;  %v220_v29 = vmul.f32 0.6931472, %v313_v28 }
 0x156   : > { %v222_v30 = vsub.f32 %v208_v19, %v220_v29 }
 0x158   : > { %224 = vst [vmem:[%s172_s26 + $0x8] sm:$0xff] %v222_v30 }
 0x159 PF: > { %s13_s12 = sadd.s32 1, %s320_s12  }
 0x15a   : > { %p10_p4 = scmp.ge.s32.totalorder %s13_s12, 6  }
 0x15c   :  { %12 = sbr.rel (!%p10_p4) target bundleno = 1 (0x1), region = 62 }

// kernel: lr_forward.4
= control target key start
LH: loop header
LB: loop body
LE: loop exit
PB: predicated region body
PF: predicated region fallthrough
CT: control target
= control target key end

     0   :  { %s620_s21 = smov 0   ;;  %s702_s0 = inlined_call_operand.vmem [shape: bf16[64,128], index: 0, kind: input, shape index: {}]   ;;  %s703_s1 = inlined_call_operand.vmem [shape: bf16[128,128], index: 1, kind: input, shape index: {}]   ;;  %s704_s2 = inlined_call_operand.vmem [shape: f32[1,128], index: 2, kind: input, shape index: {}]   ;;  %s705_s3 = inlined_call_operand.vmem [shape: f32[1,128], index: 3, kind: input, shape index: {}]   ;;  %s706_s4 = inlined_call_operand.vmem [shape: bf16[64,128], index: 4, kind: output, shape index: {0}]   ;;  %s707_s5 = inlined_call_operand.vmem [shape: f32[1,128], index: 5, kind: output, shape index: {1}]   ;;  %s708_s6 = inlined_call_operand.vmem [shape: f32[1,128], index: 6, kind: output, shape index: {2}]  }
   0x1 LB: > { %s626_s22 = sadd.s32 4294967295, %s580_s21   ;;  %p496_p0 = scmp.ge.s32.totalorder %s580_s21, 1  ;;  %s580_s21 = sphi %s620_s21, %s17_s21  }
   0x2   : > { %p208_p1 = scmp.lt.s32.totalorder %s580_s21, 5 }
   0x4   : > { %p209_p2 = pnand %p496_p0, %p208_p1 }
   0x5   : > { %v563_v0 = vld [vmem:[%s703_s1] sm:$0xff] (!%p209_p2)   ;;  %v582_v1 = vmov (!%p209_p2), 0.0   ;;  %v564_v2 = vld [vmem:[%s703_s1 + $0x8] sm:$0xff] (!%p209_p2)   ;;  %vm583_vm0 = vmmov (!%p209_p2), 0   ;;  %s497_s27 = sshll.u32 (!%p209_p2), %s626_s22, 1  ;;  %v565_v3 = vld [vmem:[%s703_s1 + $0x10] sm:$0xff] (!%p209_p2)  }
   0x6   : > { %212 = sbr.rel (%p209_p2) target bundleno = 308 (0x134), region = 36  ;;  %532 = vmatprep.subr.bf16.mxu0 (!%p209_p2), %v582_v1  ;;  %548 = vmatprep.mubr.msk.bf16.mxu0 (!%p209_p2), %vm583_vm0, %v582_v1  ;;  %p239_p3 = scmp.lt.s32.totalorder (!%p209_p2), %s497_s27, 7  ;;  %v566_v4 = vld [vmem:[%s703_s1 + $0x18] sm:$0xff] (!%p209_p2)   ;;  %v567_v5 = vld [vmem:[%s703_s1 + $0x20] sm:$0xff] (!%p209_p2)   ;;  %v568_v6 = vld [vmem:[%s703_s1 + $0x28] sm:$0xff] (!%p209_p2)  }
   0x7   : > { %533 = vmatpush3.bf16.msra.mxu0 (!%p209_p2), %v563_v0  ;;  %v569_v7 = vld [vmem:[%s703_s1 + $0x30] sm:$0xff] (!%p209_p2)   ;;  %v570_v8 = vld [vmem:[%s703_s1 + $0x38] sm:$0xff] (!%p209_p2)   ;;  %p512_p4 = scmp.ne.s32.totalorder (!%p209_p2), %s626_s22, 0 }
   0x8   : > { %534 = vmatprep.subr.bf16.mxu0 (!%p209_p2), %v582_v1 }
   0xb   : > { %535 = vmatpush3.bf16.msra.mxu0 (!%p209_p2), %v564_v2 }
   0xc   : > { %536 = vmatprep.subr.bf16.mxu0 (!%p209_p2), %v582_v1 }
   0xd   : > { %s710_s27 = smov (!%p239_p3, %s497_s27), 7  ;;  %v584_v17 = vmov (!%p512_p4), 0.0  }
   0xe   : > { %s498_s30 = sshll.u32 %s710_s27, 2  ;;  %380 = vst [vmem:[%s707_s5] sm:$0x1] (!%p512_p4), %v584_v17  ;;  %381 = vst [vmem:[%s708_s6] sm:$0x1] (!%p512_p4), %v584_v17 }
   0xf   : > { %s242_s9 = scalar_lea.vmem %s702_s0, %s498_s30  ;;  %537 = vmatpush3.bf16.msra.mxu0 %v565_v3  ;;  %s248_s24 = scalar_lea.vmem %s706_s4, %s498_s30 }
  0x10   : > { %538 = vmatprep.subr.bf16.mxu0 %v582_v1  ;;  %v571_v9 = vld [vmem:[%s242_s9] sm:$0xff]  }
  0x13   : > { %539 = vmatpush3.bf16.msra.mxu0 %v566_v4 }
  0x14   : > { %540 = vmatprep.subr.bf16.mxu0 %v582_v1 }
  0x17   : > { %541 = vmatpush3.bf16.msra.mxu0 %v567_v5 }
  0x18   : > { %542 = vmatprep.subr.bf16.mxu0 %v582_v1 }
  0x1b   : > { %543 = vmatpush3.bf16.msra.mxu0 %v568_v6 }
  0x1c   : > { %544 = vmatprep.subr.bf16.mxu0 %v582_v1 }
  0x1f   : > { %545 = vmatpush3.bf16.msra.mxu0 %v569_v7 }
  0x20   : > { %546 = vmatprep.subr.bf16.mxu0 %v582_v1 }
  0x23   : > { %547 = vmatpush3.bf16.msra.mxu0 %v570_v8 }
  0x26   : > { %549 = vmatmul.mubr.bf16.vlgmr.msra.gmra.mrb[0].mxu0 %v571_v9 }
  0xf8   : > { %379 = sbr.rel (%p512_p4) target bundleno = 255 (0xff), region = 40 }
  0xf9   : > { %v357_v10 = vpop.f32.mrb[0].mxu0 }
  0xfa   : > { %v550_v11 = vpop.f32.mrb[1].mxu0 }
  0xfb   : > { %v360_v12 = vpop.f32.mrb[2].mxu0 }
  0xfc   : > { %v364_v13 = vpack.c.bf16 %v360_v12, %v357_v10  ;;  %v551_v14 = vpop.f32.mrb[3].mxu0 }
  0xfe   : > { %522 = vst [vmem:[%s248_s24] sm:$0xff] %v364_v13   ;;  %v374_v15 = vunpack.c.l.bf16 %v364_v13  ;;  %v375_v16 = vunpack.c.h.bf16 %v364_v13 }
  0xff PF: > { %v382_v31 = vld [vmem:[%s707_s5] sm:$0x1]  ;;  %p513_p5 = scmp.ne.s32.totalorder %s626_s22, 3 }
 0x100   : > { %v383_v18 = vadd.f32 %v375_v16, %v374_v15  ;;  %v393_v19 = vmul.f32 %v374_v15, %v374_v15  ;;  %v394_v20 = vmul.f32 %v375_v16, %v375_v16  ;;  %v392_v34 = vld [vmem:[%s708_s6] sm:$0x1] }
 0x101   : > { %v415_v46 = vld [vmem:[%s704_s2] sm:$0x1] (!%p513_p5) }
 0x102   : > { %v384_v21 = vrot.slane %v383_v18, 4  ;;  %v395_v22 = vadd.f32 %v394_v20, %v393_v19  ;;  %v420_v49 = vld [vmem:[%s705_s3] sm:$0x1] (!%p513_p5) }
 0x104   : > { %v385_v23 = vadd.f32 %v384_v21, %v383_v18  ;;  %v396_v24 = vrot.slane %v395_v22, 4 }
 0x106   : > { %v386_v25 = vrot.slane %v385_v23, 2  ;;  %v397_v26 = vadd.f32 %v396_v24, %v395_v22 }
 0x108   : > { %v387_v27 = vadd.f32 %v386_v25, %v385_v23  ;;  %v398_v28 = vrot.slane %v397_v26, 2 }
 0x10a   : > { %v388_v29 = vrot.slane %v387_v27, 1  ;;  %v399_v30 = vadd.f32 %v398_v28, %v397_v26 }
 0x10c   : > { %v389_v32 = vadd.f32 %v388_v29, %v387_v27  ;;  %v400_v33 = vrot.slane %v399_v30, 1  ;;  %407 = sbr.rel (%p513_p5) target bundleno = 308 (0x134), region = 44 }
 0x10e   : > { %v390_v35 = vadd.f32 %v389_v32, %v382_v31  ;;  %v401_v36 = vadd.f32 %v400_v33, %v399_v30 }
 0x110   : > { %391 = vst [vmem:[%s707_s5] sm:$0x1] %v390_v35  ;;  %v402_v37 = vadd.f32 %v401_v36, %v392_v34 }
 0x112   : > { %403 = vst [vmem:[%s708_s6] sm:$0x1] %v402_v37 }
 0x117   : > { %v408_v38 = vld [vmem:[%s707_s5] sm:$0x1] }
 0x118   : > { %v409_v40 = vmul.f32 0.016666668, %v408_v38 }
 0x119   : > { %v410_v39 = vld [vmem:[%s708_s6] sm:$0x1] }
 0x11a   : > { %v411_v41 = vmul.f32 0.016666668, %v410_v39  ;;  %v412_v42 = vmul.f32 %v409_v40, %v409_v40 }
 0x11c   : > { %v413_v43 = vsub.f32 %v411_v41, %v412_v42 }
 0x11e   : > { %v414_v44 = vmax.f32 %v413_v43, 0.0 }
 0x120   : > { %v416_v45 = vadd.f32 1e-05, %v414_v44 }
 0x122   : > { %572 = vrsqrt.f32 %v416_v45 }
 0x12c   : > { %v573_v47 = vpop.eup %572 }
 0x12d   : > { %v418_v48 = vmul.f32 %v573_v47, %v415_v46 }
 0x12f   : > { %419 = vst [vmem:[%s707_s5] sm:$0x1] %v418_v48  ;;  %v421_v50 = vmul.f32 %v418_v48, %v409_v40 }
 0x131   : > { %v422_v51 = vsub.f32 %v420_v49, %v421_v50 }
 0x133   : > { %423 = vst [vmem:[%s708_s6] sm:$0x1] %v422_v51 }
 0x134 PF: > { %s17_s21 = sadd.s32 1, %s580_s21  }
 0x135   : > { %p14_p6 = scmp.ge.s32.totalorder %s17_s21, 6  }
 0x137   :  { %16 = sbr.rel (!%p14_p6) target bundleno = 1 (0x1), region = 90 }

// kernel: lr_forward.5
= control target key start
LH: loop header
LB: loop body
LE: loop exit
PB: predicated region body
PF: predicated region fallthrough
CT: control target
= control target key end

     0   :  { %s724_s27 = smov 0   ;;  %s820_s0 = inlined_call_operand.vmem [shape: bf16[64,128], index: 0, kind: input, shape index: {}]   ;;  %s821_s1 = inlined_call_operand.vmem [shape: f32[1,128], index: 1, kind: input, shape index: {}]   ;;  %s822_s2 = inlined_call_operand.vmem [shape: f32[1,128], index: 2, kind: input, shape index: {}]   ;;  %s823_s3 = inlined_call_operand.vmem [shape: bf16[128,128], index: 3, kind: input, shape index: {}]   ;;  %s824_s4 = inlined_call_operand.vmem [shape: f32[1,128], index: 4, kind: input, shape index: {}]   ;;  %s825_s5 = inlined_call_operand.vmem [shape: f32[1,128], index: 5, kind: input, shape index: {}]   ;;  %s826_s6 = inlined_call_operand.vmem [shape: bf16[64,128], index: 6, kind: output, shape index: {0}]   ;;  %s827_s7 = inlined_call_operand.vmem [shape: f32[1,128], index: 7, kind: output, shape index: {1}]   ;;  %s828_s8 = inlined_call_operand.vmem [shape: f32[1,128], index: 8, kind: output, shape index: {2}]  }
   0x1 LB: > { %s730_s28 = sadd.s32 4294967295, %s674_s27   ;;  %p582_p0 = scmp.ge.s32.totalorder %s674_s27, 1  ;;  %s674_s27 = sphi %s724_s27, %s19_s27  }
   0x2   : > { %p258_p1 = scmp.lt.s32.totalorder %s674_s27, 5 }
   0x4   : > { %p259_p2 = pnand %p582_p0, %p258_p1 }
   0x5   : > { %v658_v0 = vld [vmem:[%s823_s3] sm:$0xff] (!%p259_p2)   ;;  %v676_v1 = vmov (!%p259_p2), 0.0   ;;  %v659_v2 = vld [vmem:[%s823_s3 + $0x8] sm:$0xff] (!%p259_p2)   ;;  %vm677_vm0 = vmmov (!%p259_p2), 0   ;;  %s583_s11 = sshll.u32 (!%p259_p2), %s730_s28, 1  ;;  %v660_v3 = vld [vmem:[%s823_s3 + $0x10] sm:$0xff] (!%p259_p2)   ;;  %v330_v6 = vlaneseq (!%p259_p2) }
   0x6   : > { %262 = sbr.rel (%p259_p2) target bundleno = 308 (0x134), region = 44  ;;  %627 = vmatprep.subr.bf16.mxu0 (!%p259_p2), %v676_v1  ;;  %643 = vmatprep.mubr.msk.bf16.mxu0 (!%p259_p2), %vm677_vm0, %v676_v1  ;;  %p293_p3 = scmp.lt.s32.totalorder (!%p259_p2), %s583_s11, 7  ;;  %v661_v4 = vld [vmem:[%s823_s3 + $0x18] sm:$0xff] (!%p259_p2)   ;;  %v662_v9 = vld [vmem:[%s823_s3 + $0x20] sm:$0xff] (!%p259_p2)   ;;  %v663_v14 = vld [vmem:[%s823_s3 + $0x28] sm:$0xff] (!%p259_p2)  }
   0x7   : > { %628 = vmatpush3.bf16.msra.mxu0 (!%p259_p2), %v658_v0  ;;  %v587_v10 = vld [vmem:[%s821_s1] ss:$0 sm:$0xff] (!%p259_p2)  ;;  %v331_v11 = vshrl.u32 (!%p259_p2), %v330_v6, 7  ;;  %s589_s24 = sshll.u32 (!%p259_p2), %s730_s28, 4  ;;  %v664_v20 = vld [vmem:[%s823_s3 + $0x30] sm:$0xff] (!%p259_p2)   ;;  %v665_v25 = vld [vmem:[%s823_s3 + $0x38] sm:$0xff] (!%p259_p2)  }
   0x8   : > { %629 = vmatprep.subr.bf16.mxu0 (!%p259_p2), %v676_v1  ;;  %v588_v15 = vld [vmem:[%s822_s2] ss:$0 sm:$0xff] (!%p259_p2)  ;;  %v333_v17 = vstv (!%p259_p2), %s589_s24  ;;  %p603_p4 = scmp.ne.s32.totalorder (!%p259_p2), %s730_s28, 0 }
   0x9   : > { %v332_v16 = vadd.s32 (!%p259_p2), 8, %v331_v11  ;;  %v334_v21 = vadd.s32 (!%p259_p2), %v333_v17, %v331_v11 }
   0xb   : > { %630 = vmatpush3.bf16.msra.mxu0 (!%p259_p2), %v659_v2  ;;  %v335_v22 = vadd.s32 (!%p259_p2), %v333_v17, %v332_v16  ;;  %vm336_vm1 = vcmp.lt.s32.totalorder (!%p259_p2), %v334_v21, 60 }
   0xc   : > { %631 = vmatprep.subr.bf16.mxu0 (!%p259_p2), %v676_v1 }
   0xd   : > { %s830_s11 = smov (!%p293_p3, %s583_s11), 7  ;;  %vm337_vm2 = vcmp.lt.s32.totalorder %v335_v22, 60  ;;  %v678_v34 = vmov (!%p603_p4), 0.0  }
   0xe   : > { %s584_s14 = sshll.u32 %s830_s11, 2  ;;  %vm598_vm3 = vmpackc.low %vm337_vm2, %vm336_vm1  ;;  %466 = vst [vmem:[%s827_s7] sm:$0x1] (!%p603_p4), %v678_v34 }
   0xf   : > { %s296_s17 = scalar_lea.vmem %s820_s0, %s584_s14  ;;  %632 = vmatpush3.bf16.msra.mxu0 %v660_v3  ;;  %467 = vst [vmem:[%s828_s8] sm:$0x1] (!%p603_p4), %v678_v34 }
  0x10   : > { %v610_v5 = vld [vmem:[%s296_s17] sm:$0xff]   ;;  %633 = vmatprep.subr.bf16.mxu0 %v676_v1  ;;  %s302_s17 = scalar_lea.vmem %s826_s6, %s584_s14 }
  0x11   : > { %v611_v7 = vunpack.c.l.bf16 %v610_v5  ;;  %v612_v8 = vunpack.c.h.bf16 %v610_v5 }
  0x13   : > { %634 = vmatpush3.bf16.msra.mxu0 %v661_v4  ;;  %v316_v12 = vmul.f32 %v611_v7, %v587_v10  ;;  %v317_v13 = vmul.f32 %v612_v8, %v587_v10 }
  0x14   : > { %635 = vmatprep.subr.bf16.mxu0 %v676_v1 }
  0x15   : > { %v325_v18 = vadd.f32 %v588_v15, %v316_v12  ;;  %v326_v19 = vadd.f32 %v588_v15, %v317_v13 }
  0x17   : > { %636 = vmatpush3.bf16.msra.mxu0 %v662_v9  ;;  %v327_v23 = vmax.f32 %v325_v18, 0.0  ;;  %v328_v24 = vmax.f32 %v326_v19, 0.0 }
  0x18   : > { %637 = vmatprep.subr.bf16.mxu0 %v676_v1 }
  0x19   : > { %v599_v26 = vpack.c.bf16 %v328_v24, %v327_v23 }
  0x1b   : > { %638 = vmatpush3.bf16.msra.mxu0 %v663_v14 }
  0x1c   : > { %639 = vmatprep.subr.bf16.mxu0 %v676_v1 }
  0x1f   : > { %640 = vmatpush3.bf16.msra.mxu0 %v664_v20 }
  0x20   : > { %641 = vmatprep.subr.bf16.mxu0 %v676_v1 }
  0x23   : > { %642 = vmatpush3.bf16.msra.mxu0 %v665_v25 }
  0x26   : > { %644 = vmatmul.mubr.msk.bf16.vlgmr.msra.gmra.mrb[0].mxu0 %vm598_vm3, %v599_v26 }
  0xf8   : > { %465 = sbr.rel (%p603_p4) target bundleno = 255 (0xff), region = 48 }
  0xf9   : > { %v443_v27 = vpop.f32.mrb[0].mxu0 }
  0xfa   : > { %v645_v28 = vpop.f32.mrb[1].mxu0 }
  0xfb   : > { %v446_v29 = vpop.f32.mrb[2].mxu0 }
  0xfc   : > { %v450_v30 = vpack.c.bf16 %v446_v29, %v443_v27  ;;  %v646_v31 = vpop.f32.mrb[3].mxu0 }
  0xfe   : > { %617 = vst [vmem:[%s302_s17] sm:$0xff] %v450_v30   ;;  %v460_v32 = vunpack.c.l.bf16 %v450_v30  ;;  %v461_v33 = vunpack.c.h.bf16 %v450_v30 }
  0xff PF: > { %v468_v48 = vld [vmem:[%s827_s7] sm:$0x1]  ;;  %p604_p5 = scmp.ne.s32.totalorder %s730_s28, 3 }
 0x100   : > { %v469_v35 = vadd.f32 %v461_v33, %v460_v32  ;;  %v479_v36 = vmul.f32 %v460_v32, %v460_v32  ;;  %v480_v37 = vmul.f32 %v461_v33, %v461_v33  ;;  %v478_v51 = vld [vmem:[%s828_s8] sm:$0x1] }
 0x101   : > { %v501_v63 = vld [vmem:[%s824_s4] sm:$0x1] (!%p604_p5) }
 0x102   : > { %v470_v38 = vrot.slane %v469_v35, 4  ;;  %v481_v39 = vadd.f32 %v480_v37, %v479_v36  ;;  %v506_v2 = vld [vmem:[%s825_s5] sm:$0x1] (!%p604_p5) }
 0x104   : > { %v471_v40 = vadd.f32 %v470_v38, %v469_v35  ;;  %v482_v41 = vrot.slane %v481_v39, 4 }
 0x106   : > { %v472_v42 = vrot.slane %v471_v40, 2  ;;  %v483_v43 = vadd.f32 %v482_v41, %v481_v39 }
 0x108   : > { %v473_v44 = vadd.f32 %v472_v42, %v471_v40  ;;  %v484_v45 = vrot.slane %v483_v43, 2 }
 0x10a   : > { %v474_v46 = vrot.slane %v473_v44, 1  ;;  %v485_v47 = vadd.f32 %v484_v45, %v483_v43 }
 0x10c   : > { %v475_v49 = vadd.f32 %v474_v46, %v473_v44  ;;  %v486_v50 = vrot.slane %v485_v47, 1  ;;  %493 = sbr.rel (%p604_p5) target bundleno = 308 (0x134), region = 52 }
 0x10e   : > { %v476_v52 = vadd.f32 %v475_v49, %v468_v48  ;;  %v487_v53 = vadd.f32 %v486_v50, %v485_v47 }
 0x110   : > { %477 = vst [vmem:[%s827_s7] sm:$0x1] %v476_v52  ;;  %v488_v54 = vadd.f32 %v487_v53, %v478_v51 }
 0x112   : > { %489 = vst [vmem:[%s828_s8] sm:$0x1] %v488_v54 }
 0x117   : > { %v494_v55 = vld [vmem:[%s827_s7] sm:$0x1] }
 0x118   : > { %v495_v57 = vmul.f32 0.016666668, %v494_v55 }
 0x119   : > { %v496_v56 = vld [vmem:[%s828_s8] sm:$0x1] }
 0x11a   : > { %v497_v58 = vmul.f32 0.016666668, %v496_v56  ;;  %v498_v59 = vmul.f32 %v495_v57, %v495_v57 }
 0x11c   : > { %v499_v60 = vsub.f32 %v497_v58, %v498_v59 }
 0x11e   : > { %v500_v61 = vmax.f32 %v499_v60, 0.0 }
 0x120   : > { %v502_v62 = vadd.f32 1e-05, %v500_v61 }
 0x122   : > { %666 = vrsqrt.f32 %v502_v62 }
 0x12c   : > { %v667_v0 = vpop.eup %666 }
 0x12d   : > { %v504_v1 = vmul.f32 %v667_v0, %v501_v63 }
 0x12f   : > { %505 = vst [vmem:[%s827_s7] sm:$0x1] %v504_v1  ;;  %v507_v3 = vmul.f32 %v504_v1, %v495_v57 }
 0x131   : > { %v508_v4 = vsub.f32 %v506_v2, %v507_v3 }
 0x133   : > { %509 = vst [vmem:[%s828_s8] sm:$0x1] %v508_v4 }
 0x134 PF: > { %s19_s27 = sadd.s32 1, %s674_s27  }
 0x135   : > { %p16_p6 = scmp.ge.s32.totalorder %s19_s27, 6  }
 0x137   :  { %18 = sbr.rel (!%p16_p6) target bundleno = 1 (0x1), region = 98 }

</bundles_post_ra>
